<compile_context>
chip_gen: v6e
topology: v6e:2x2x1
jax: 0.10.0
libtpu: 0.0.40
codegen_flags: <defaults>
</compile_context>

<pallas_src>
import functools
from typing import NamedTuple

import jax
import jax.numpy as jnp
from jax.experimental import pallas as pl
from jax.experimental.pallas import tpu as pltpu


class QTensor(NamedTuple):
    """Minimal stand-in for the plugin's QTensor."""
    int_repr: jax.Array
    scale: jax.Array
    zero_point: jax.Array
    dtype: str  # e.g. "qint8"


# ---------------------------------------------------------------------------
# Layout / VMEM helpers (tiled-byte accounting, per-generation budgets)
# ---------------------------------------------------------------------------

_LANES = 128


def _sublane_pack(dtype) -> int:
    """Rows packed per vreg sublane group: 8 for 4-byte, 16 for 2-byte, 32 for 1-byte."""
    itemsize = jnp.dtype(dtype).itemsize
    return max(8, 32 // itemsize)


def _round_up(x: int, m: int) -> int:
    return ((x + m - 1) // m) * m


def _tiled_bytes(rows: int, cols: int, dtype) -> int:
    """VMEM bytes of a (rows, cols) slab after (sublane_pack, 128) tile padding."""
    pack = _sublane_pack(dtype)
    return _round_up(rows, pack) * _round_up(cols, _LANES) * jnp.dtype(dtype).itemsize


def _target_block_bytes() -> int:
    """Tiled (in+out) byte budget per block; x2 double-buffering must stay under
    every generation's scoped-VMEM default (v5e 16 MiB, v6e/v7x 32 MiB)."""
    try:
        kind = jax.devices()[0].device_kind.lower()
    except Exception:  # pragma: no cover - defensive
        kind = ""
    if "v6" in kind or "v7" in kind:
        return 8 << 20   # 2 x 8 MiB resident, comfortably under 32 MiB scoped
    return 5 << 20       # v5e / unknown: 2 x 5 MiB resident < 16 MiB scoped


def _choose_fold(num_planes: int, rows: int, pack: int, max_fold: int = 32) -> int:
    """Smallest divisor G of num_planes (capped) such that G*rows fills the
    sublane packing; folding planes into the sublane axis is a free contiguous
    reshape for row-major NCHW."""
    best = 1
    for g in range(1, min(num_planes, max_fold) + 1):
        if num_planes % g:
            continue
        best = g
        if g * rows >= pack:
            break
    return best


def _choose_block_planes(num_planes: int, tiled_bytes_per_plane: int,
                         target_bytes: int, min_grid_steps: int = 8) -> int:
    """Planes per block: as many as fit the tiled byte budget while keeping
    >= min_grid_steps grid steps when possible (v7x shards the parallel grid
    across 2 TensorCores -> >= 4 pipelined steps per core)."""
    by_budget = max(1, target_bytes // max(1, tiled_bytes_per_plane))
    by_steps = max(1, num_planes // min_grid_steps)
    return int(max(1, min(by_budget, by_steps, num_planes)))


# ---------------------------------------------------------------------------
# Kernel
# ---------------------------------------------------------------------------

def _replication_pad2d_kernel(x_ref, o_ref, *, pads, fold, in_h, out_h):
    """x_ref block: (B, fold*H, W) -> o_ref block: (B, fold*Ho, Wo).

    Each super-plane stacks `fold` original (H, W) planes along the sublane
    axis.  For every folded plane we write up to 9 static regions (interior,
    4 edges, 4 corners) directly into o_ref; edge/corner regions are
    broadcasts of a single source row / column.  All slice bounds and pad
    amounts are static Python ints, so every store is a plain vst.
    """
    pad_l, pad_r, pad_t, pad_b = pads
    Bp, _, W = x_ref.shape
    H, Ho = in_h, out_h

    # Row / column bands: (out_start, out_size, src_start, src_size).
    h_bands = []
    if pad_t:
        h_bands.append((0, pad_t, 0, 1))
    h_bands.append((pad_t, H, 0, H))
    if pad_b:
        h_bands.append((pad_t + H, pad_b, H - 1, 1))

    w_bands = []
    if pad_l:
        w_bands.append((0, pad_l, 0, 1))
    w_bands.append((pad_l, W, 0, W))
    if pad_r:
        w_bands.append((pad_l + W, pad_r, W - 1, 1))

    for g in range(fold):
        src0, dst0 = g * H, g * Ho
        for oh, nh, sh, kh in h_bands:
            for ow, nw, sw, kw in w_bands:
                src = x_ref[:, src0 + sh:src0 + sh + kh, sw:sw + kw]  # (B, kh, kw)
                o_ref[:, dst0 + oh:dst0 + oh + nh, ow:ow + nw] = (
                    jnp.broadcast_to(src, (Bp, nh, nw)))


# ---------------------------------------------------------------------------
# Wrapper
# ---------------------------------------------------------------------------

def replication_pad2d_int(x, padding):
    """Edge ('replicate') padding of an integer NCHW tensor.

    padding = (left, right, top, bottom) as static Python ints (PyTorch order).
    """
    pad_l, pad_r, pad_t, pad_b = (int(p) for p in padding)
    if min(pad_l, pad_r, pad_t, pad_b) < 0:
        raise ValueError("negative padding is not supported")
    N, C, H, W = x.shape
    Ho, Wo = H + pad_t + pad_b, W + pad_l + pad_r

    # Fast path: nothing to pad -> no HBM round trip.
    if pad_l == pad_r == pad_t == pad_b == 0:
        return x

    NC = N * C
    pack = _sublane_pack(x.dtype)

    # Fold G consecutive planes into the sublane axis (free contiguous reshape
    # for row-major NCHW) so small int8 planes fill the 32-row sublane packing.
    G = _choose_fold(NC, H, pack)
    NS = NC // G                       # number of super-planes
    Hi_s, Ho_s = G * H, G * Ho

    x_planes = x.reshape(NS, Hi_s, W)

    # Tiled (not logical) per-super-plane VMEM bytes: input + output slabs.
    per_super = _tiled_bytes(Hi_s, W, x.dtype) + _tiled_bytes(Ho_s, Wo, x.dtype)
    B = _choose_block_planes(NS, per_super, _target_block_bytes())
    grid = (pl.cdiv(NS, B),)           # B need not divide NS (partial last block)

    kernel = functools.partial(
        _replication_pad2d_kernel,
        pads=(pad_l, pad_r, pad_t, pad_b), fold=G, in_h=H, out_h=Ho)

    # Logical HBM traffic (read + write) for the XLA scheduler.
    itemsize = jnp.dtype(x.dtype).itemsize
    hbm_bytes = NC * (H * W + Ho * Wo) * itemsize

    compiler_kwargs = dict(dimension_semantics=("parallel",))
    resident = 2 * B * per_super       # double-buffered in + out blocks (tiled)
    if resident > (12 << 20):
        # Only needed for huge single planes; keep headroom and a hard cap.
        compiler_kwargs["vmem_limit_bytes"] = int(min(resident + (4 << 20), 96 << 20))

    out_planes = pl.pallas_call(
        kernel,
        out_shape=jax.ShapeDtypeStruct((NS, Ho_s, Wo), x.dtype),
        grid_spec=pltpu.PrefetchScalarGridSpec(
            num_scalar_prefetch=0,
            grid=grid,
            in_specs=[pl.BlockSpec((B, Hi_s, W), lambda i: (i, 0, 0))],
            out_specs=pl.BlockSpec((B, Ho_s, Wo), lambda i: (i, 0, 0)),
        ),
        compiler_params=pltpu.CompilerParams(**compiler_kwargs),
        cost_estimate=pl.CostEstimate(
            flops=0, transcendentals=0, bytes_accessed=hbm_bytes),
    )(x_planes)

    return out_planes.reshape(N, C, Ho, Wo)


class ReplicationPad2d:
    """Quantized ReplicationPad2d (forward of `_ReplicationPadNd`)."""

    def __init__(self, padding):
        if isinstance(padding, int):
            padding = (padding,) * 4
        self.padding = tuple(int(p) for p in padding)  # (left, right, top, bottom)

    def __call__(self, data: QTensor) -> QTensor:
        padded = replication_pad2d_int(data.int_repr, self.padding)
        # scale / zero_point / dtype pass through unchanged (replicate padding
        # does not alter the quantization parameters).
        return QTensor(padded, data.scale, data.zero_point, data.dtype)

    def extra_repr(self) -> str:
        return "{}".format(self.padding)


# ---------------------------------------------------------------------------
# Self-test
# ---------------------------------------------------------------------------

def _check(key, shape, padding):
    N, C, H, W = shape
    x_int8 = jax.random.randint(
        key, (N, C, H, W), minval=-128, maxval=128, dtype=jnp.int32
    ).astype(jnp.int8)
    q = QTensor(
        int_repr=x_int8,
        scale=jnp.asarray(0.05, jnp.float32),
        zero_point=jnp.asarray(0, jnp.int32),
        dtype="qint8",
    )
    mod = ReplicationPad2d(padding)
    out = mod(q)
    jax.block_until_ready(out.int_repr)

    l, r, t, b = mod.padding
    ref = jnp.pad(x_int8, ((0, 0), (0, 0), (t, b), (l, r)), mode="edge")
    assert out.int_repr.shape == ref.shape
    assert out.int_repr.dtype == x_int8.dtype
    assert bool(jnp.all(out.int_repr == ref))
    assert out.scale == q.scale and out.dtype == q.dtype


if __name__ == "__main__":
    key = jax.random.PRNGKey(0)
    k0, k1 = jax.random.split(key)
    # Primary case: (N, C, H, W) = (2, 4, 16, 16), padding (left,right,top,bottom).
    _check(k0, (2, 4, 16, 16), (1, 2, 2, 3))
    # Secondary case: zero pads on some sides, non-power-of-two plane count.
    _check(k1, (1, 3, 8, 12), (0, 3, 1, 0))
    print("KERNEL_OK")
</pallas_src>

<mosaic_0001>
module attributes {stable_mosaic.version = 11 : i64} {
  func.func @_replication_pad2d_kernel(%arg0: i32, %arg1: memref<1x32x16xi8, #tpu.memory_space<vmem>>, %arg2: memref<1x42x19xi8, #tpu.memory_space<vmem>>) attributes {dimension_semantics = [#tpu.dimension_semantics<parallel>], iteration_bounds = array<i64: 4>, scalar_prefetch = 0 : i64, scratch_operands = 0 : i64, tpu.core_type = #tpu.core_type<tc>, window_params = [{transform_indices = @transform_0, window_bounds = array<i64: 1, 32, 16>}, {transform_indices = @transform_1, window_bounds = array<i64: 1, 42, 19>}]} {
    %c0 = arith.constant 0 : index
    %c0_0 = arith.constant 0 : index
    %c0_1 = arith.constant 0 : index
    %0 = vector.load %arg1[%c0, %c0_0, %c0_1] : memref<1x32x16xi8, #tpu.memory_space<vmem>>, vector<1x1x1xi8>
    %1 = vector.shape_cast %0 : vector<1x1x1xi8> to vector<1x1x1xi8>
    %2 = vector.broadcast %1 : vector<1x1x1xi8> to vector<1x2x1xi8>
    %c0_2 = arith.constant 0 : index
    %c0_3 = arith.constant 0 : index
    %c0_4 = arith.constant 0 : index
    %3 = vector.load %arg2[%c0_2, %c0_3, %c0_4] : memref<1x42x19xi8, #tpu.memory_space<vmem>>, vector<1x2x1xi8>
    tpu.vector_store %arg2[%c0_2, %c0_3, %c0_4], %2 {strides = array<i32>} : memref<1x42x19xi8, #tpu.memory_space<vmem>>, vector<1x2x1xi8>,
    %c0_5 = arith.constant 0 : index
    %c0_6 = arith.constant 0 : index
    %c0_7 = arith.constant 0 : index
    %4 = vector.load %arg1[%c0_5, %c0_6, %c0_7] : memref<1x32x16xi8, #tpu.memory_space<vmem>>, vector<1x1x16xi8>
    %5 = vector.shape_cast %4 : vector<1x1x16xi8> to vector<1x1x16xi8>
    %6 = vector.broadcast %5 : vector<1x1x16xi8> to vector<1x2x16xi8>
    %c0_8 = arith.constant 0 : index
    %c0_9 = arith.constant 0 : index
    %c1 = arith.constant 1 : index
    %7 = vector.load %arg2[%c0_8, %c0_9, %c1] : memref<1x42x19xi8, #tpu.memory_space<vmem>>, vector<1x2x16xi8>
    tpu.vector_store %arg2[%c0_8, %c0_9, %c1], %6 {strides = array<i32>} : memref<1x42x19xi8, #tpu.memory_space<vmem>>, vector<1x2x16xi8>,
    %c0_10 = arith.constant 0 : index
    %c0_11 = arith.constant 0 : index
    %c15 = arith.constant 15 : index
    %8 = vector.load %arg1[%c0_10, %c0_11, %c15] : memref<1x32x16xi8, #tpu.memory_space<vmem>>, vector<1x1x1xi8>
    %9 = vector.shape_cast %8 : vector<1x1x1xi8> to vector<1x1x1xi8>
    %10 = vector.broadcast %9 : vector<1x1x1xi8> to vector<1x2x2xi8>
    %c0_12 = arith.constant 0 : index
    %c0_13 = arith.constant 0 : index
    %c17 = arith.constant 17 : index
    %11 = vector.load %arg2[%c0_12, %c0_13, %c17] : memref<1x42x19xi8, #tpu.memory_space<vmem>>, vector<1x2x2xi8>
    tpu.vector_store %arg2[%c0_12, %c0_13, %c17], %10 {strides = array<i32>} : memref<1x42x19xi8, #tpu.memory_space<vmem>>, vector<1x2x2xi8>,
    %c0_14 = arith.constant 0 : index
    %c0_15 = arith.constant 0 : index
    %c0_16 = arith.constant 0 : index
    %12 = vector.load %arg1[%c0_14, %c0_15, %c0_16] : memref<1x32x16xi8, #tpu.memory_space<vmem>>, vector<1x16x1xi8>
    %c0_17 = arith.constant 0 : index
    %c2 = arith.constant 2 : index
    %c0_18 = arith.constant 0 : index
    %13 = vector.load %arg2[%c0_17, %c2, %c0_18] : memref<1x42x19xi8, #tpu.memory_space<vmem>>, vector<1x16x1xi8>
    tpu.vector_store %arg2[%c0_17, %c2, %c0_18], %12 {strides = array<i32>} : memref<1x42x19xi8, #tpu.memory_space<vmem>>, vector<1x16x1xi8>,
    %c0_19 = arith.constant 0 : index
    %c0_20 = arith.constant 0 : index
    %c0_21 = arith.constant 0 : index
    %14 = vector.load %arg1[%c0_19, %c0_20, %c0_21] : memref<1x32x16xi8, #tpu.memory_space<vmem>>, vector<1x16x16xi8>
    %c0_22 = arith.constant 0 : index
    %c2_23 = arith.constant 2 : index
    %c1_24 = arith.constant 1 : index
    %15 = vector.load %arg2[%c0_22, %c2_23, %c1_24] : memref<1x42x19xi8, #tpu.memory_space<vmem>>, vector<1x16x16xi8>
    tpu.vector_store %arg2[%c0_22, %c2_23, %c1_24], %14 {strides = array<i32>} : memref<1x42x19xi8, #tpu.memory_space<vmem>>, vector<1x16x16xi8>,
    %c0_25 = arith.constant 0 : index
    %c0_26 = arith.constant 0 : index
    %c15_27 = arith.constant 15 : index
    %16 = vector.load %arg1[%c0_25, %c0_26, %c15_27] : memref<1x32x16xi8, #tpu.memory_space<vmem>>, vector<1x16x1xi8>
    %17 = vector.shape_cast %16 : vector<1x16x1xi8> to vector<1x16x1xi8>
    %18 = vector.broadcast %17 : vector<1x16x1xi8> to vector<1x16x2xi8>
    %c0_28 = arith.constant 0 : index
    %c2_29 = arith.constant 2 : index
    %c17_30 = arith.constant 17 : index
    %19 = vector.load %arg2[%c0_28, %c2_29, %c17_30] : memref<1x42x19xi8, #tpu.memory_space<vmem>>, vector<1x16x2xi8>
    tpu.vector_store %arg2[%c0_28, %c2_29, %c17_30], %18 {strides = array<i32>} : memref<1x42x19xi8, #tpu.memory_space<vmem>>, vector<1x16x2xi8>,
    %c0_31 = arith.constant 0 : index
    %c15_32 = arith.constant 15 : index
    %c0_33 = arith.constant 0 : index
    %20 = vector.load %arg1[%c0_31, %c15_32, %c0_33] : memref<1x32x16xi8, #tpu.memory_space<vmem>>, vector<1x1x1xi8>
    %21 = vector.shape_cast %20 : vector<1x1x1xi8> to vector<1x1x1xi8>
    %22 = vector.broadcast %21 : vector<1x1x1xi8> to vector<1x3x1xi8>
    %c0_34 = arith.constant 0 : index
    %c18 = arith.constant 18 : index
    %c0_35 = arith.constant 0 : index
    %23 = vector.load %arg2[%c0_34, %c18, %c0_35] : memref<1x42x19xi8, #tpu.memory_space<vmem>>, vector<1x3x1xi8>
    tpu.vector_store %arg2[%c0_34, %c18, %c0_35], %22 {strides = array<i32>} : memref<1x42x19xi8, #tpu.memory_space<vmem>>, vector<1x3x1xi8>,
    %c0_36 = arith.constant 0 : index
    %c15_37 = arith.constant 15 : index
    %c0_38 = arith.constant 0 : index
    %24 = vector.load %arg1[%c0_36, %c15_37, %c0_38] : memref<1x32x16xi8, #tpu.memory_space<vmem>>, vector<1x1x16xi8>
    %25 = vector.shape_cast %24 : vector<1x1x16xi8> to vector<1x1x16xi8>
    %26 = vector.broadcast %25 : vector<1x1x16xi8> to vector<1x3x16xi8>
    %c0_39 = arith.constant 0 : index
    %c18_40 = arith.constant 18 : index
    %c1_41 = arith.constant 1 : index
    %27 = vector.load %arg2[%c0_39, %c18_40, %c1_41] : memref<1x42x19xi8, #tpu.memory_space<vmem>>, vector<1x3x16xi8>
    tpu.vector_store %arg2[%c0_39, %c18_40, %c1_41], %26 {strides = array<i32>} : memref<1x42x19xi8, #tpu.memory_space<vmem>>, vector<1x3x16xi8>,
    %c0_42 = arith.constant 0 : index
    %c15_43 = arith.constant 15 : index
    %c15_44 = arith.constant 15 : index
    %28 = vector.load %arg1[%c0_42, %c15_43, %c15_44] : memref<1x32x16xi8, #tpu.memory_space<vmem>>, vector<1x1x1xi8>
    %29 = vector.shape_cast %28 : vector<1x1x1xi8> to vector<1x1x1xi8>
    %30 = vector.broadcast %29 : vector<1x1x1xi8> to vector<1x3x2xi8>
    %c0_45 = arith.constant 0 : index
    %c18_46 = arith.constant 18 : index
    %c17_47 = arith.constant 17 : index
    %31 = vector.load %arg2[%c0_45, %c18_46, %c17_47] : memref<1x42x19xi8, #tpu.memory_space<vmem>>, vector<1x3x2xi8>
    tpu.vector_store %arg2[%c0_45, %c18_46, %c17_47], %30 {strides = array<i32>} : memref<1x42x19xi8, #tpu.memory_space<vmem>>, vector<1x3x2xi8>,
    %c0_48 = arith.constant 0 : index
    %c16 = arith.constant 16 : index
    %c0_49 = arith.constant 0 : index
    %32 = vector.load %arg1[%c0_48, %c16, %c0_49] : memref<1x32x16xi8, #tpu.memory_space<vmem>>, vector<1x1x1xi8>
    %33 = vector.shape_cast %32 : vector<1x1x1xi8> to vector<1x1x1xi8>
    %34 = vector.broadcast %33 : vector<1x1x1xi8> to vector<1x2x1xi8>
    %c0_50 = arith.constant 0 : index
    %c21 = arith.constant 21 : index
    %c0_51 = arith.constant 0 : index
    %35 = vector.load %arg2[%c0_50, %c21, %c0_51] : memref<1x42x19xi8, #tpu.memory_space<vmem>>, vector<1x2x1xi8>
    tpu.vector_store %arg2[%c0_50, %c21, %c0_51], %34 {strides = array<i32>} : memref<1x42x19xi8, #tpu.memory_space<vmem>>, vector<1x2x1xi8>,
    %c0_52 = arith.constant 0 : index
    %c16_53 = arith.constant 16 : index
    %c0_54 = arith.constant 0 : index
    %36 = vector.load %arg1[%c0_52, %c16_53, %c0_54] : memref<1x32x16xi8, #tpu.memory_space<vmem>>, vector<1x1x16xi8>
    %37 = vector.shape_cast %36 : vector<1x1x16xi8> to vector<1x1x16xi8>
    %38 = vector.broadcast %37 : vector<1x1x16xi8> to vector<1x2x16xi8>
    %c0_55 = arith.constant 0 : index
    %c21_56 = arith.constant 21 : index
    %c1_57 = arith.constant 1 : index
    %39 = vector.load %arg2[%c0_55, %c21_56, %c1_57] : memref<1x42x19xi8, #tpu.memory_space<vmem>>, vector<1x2x16xi8>
    tpu.vector_store %arg2[%c0_55, %c21_56, %c1_57], %38 {strides = array<i32>} : memref<1x42x19xi8, #tpu.memory_space<vmem>>, vector<1x2x16xi8>,
    %c0_58 = arith.constant 0 : index
    %c16_59 = arith.constant 16 : index
    %c15_60 = arith.constant 15 : index
    %40 = vector.load %arg1[%c0_58, %c16_59, %c15_60] : memref<1x32x16xi8, #tpu.memory_space<vmem>>, vector<1x1x1xi8>
    %41 = vector.shape_cast %40 : vector<1x1x1xi8> to vector<1x1x1xi8>
    %42 = vector.broadcast %41 : vector<1x1x1xi8> to vector<1x2x2xi8>
    %c0_61 = arith.constant 0 : index
    %c21_62 = arith.constant 21 : index
    %c17_63 = arith.constant 17 : index
    %43 = vector.load %arg2[%c0_61, %c21_62, %c17_63] : memref<1x42x19xi8, #tpu.memory_space<vmem>>, vector<1x2x2xi8>
    tpu.vector_store %arg2[%c0_61, %c21_62, %c17_63], %42 {strides = array<i32>} : memref<1x42x19xi8, #tpu.memory_space<vmem>>, vector<1x2x2xi8>,
    %c0_64 = arith.constant 0 : index
    %c16_65 = arith.constant 16 : index
    %c0_66 = arith.constant 0 : index
    %44 = vector.load %arg1[%c0_64, %c16_65, %c0_66] : memref<1x32x16xi8, #tpu.memory_space<vmem>>, vector<1x16x1xi8>
    %c0_67 = arith.constant 0 : index
    %c23 = arith.constant 23 : index
    %c0_68 = arith.constant 0 : index
    %45 = vector.load %arg2[%c0_67, %c23, %c0_68] : memref<1x42x19xi8, #tpu.memory_space<vmem>>, vector<1x16x1xi8>
    tpu.vector_store %arg2[%c0_67, %c23, %c0_68], %44 {strides = array<i32>} : memref<1x42x19xi8, #tpu.memory_space<vmem>>, vector<1x16x1xi8>,
    %c0_69 = arith.constant 0 : index
    %c16_70 = arith.constant 16 : index
    %c0_71 = arith.constant 0 : index
    %46 = vector.load %arg1[%c0_69, %c16_70, %c0_71] : memref<1x32x16xi8, #tpu.memory_space<vmem>>, vector<1x16x16xi8>
    %c0_72 = arith.constant 0 : index
    %c23_73 = arith.constant 23 : index
    %c1_74 = arith.constant 1 : index
    %47 = vector.load %arg2[%c0_72, %c23_73, %c1_74] : memref<1x42x19xi8, #tpu.memory_space<vmem>>, vector<1x16x16xi8>
    tpu.vector_store %arg2[%c0_72, %c23_73, %c1_74], %46 {strides = array<i32>} : memref<1x42x19xi8, #tpu.memory_space<vmem>>, vector<1x16x16xi8>,
    %c0_75 = arith.constant 0 : index
    %c16_76 = arith.constant 16 : index
    %c15_77 = arith.constant 15 : index
    %48 = vector.load %arg1[%c0_75, %c16_76, %c15_77] : memref<1x32x16xi8, #tpu.memory_space<vmem>>, vector<1x16x1xi8>
    %49 = vector.shape_cast %48 : vector<1x16x1xi8> to vector<1x16x1xi8>
    %50 = vector.broadcast %49 : vector<1x16x1xi8> to vector<1x16x2xi8>
    %c0_78 = arith.constant 0 : index
    %c23_79 = arith.constant 23 : index
    %c17_80 = arith.constant 17 : index
    %51 = vector.load %arg2[%c0_78, %c23_79, %c17_80] : memref<1x42x19xi8, #tpu.memory_space<vmem>>, vector<1x16x2xi8>
    tpu.vector_store %arg2[%c0_78, %c23_79, %c17_80], %50 {strides = array<i32>} : memref<1x42x19xi8, #tpu.memory_space<vmem>>, vector<1x16x2xi8>,
    %c0_81 = arith.constant 0 : index
    %c31 = arith.constant 31 : index
    %c0_82 = arith.constant 0 : index
    %52 = vector.load %arg1[%c0_81, %c31, %c0_82] : memref<1x32x16xi8, #tpu.memory_space<vmem>>, vector<1x1x1xi8>
    %53 = vector.shape_cast %52 : vector<1x1x1xi8> to vector<1x1x1xi8>
    %54 = vector.broadcast %53 : vector<1x1x1xi8> to vector<1x3x1xi8>
    %c0_83 = arith.constant 0 : index
    %c39 = arith.constant 39 : index
    %c0_84 = arith.constant 0 : index
    %55 = vector.load %arg2[%c0_83, %c39, %c0_84] : memref<1x42x19xi8, #tpu.memory_space<vmem>>, vector<1x3x1xi8>
    tpu.vector_store %arg2[%c0_83, %c39, %c0_84], %54 {strides = array<i32>} : memref<1x42x19xi8, #tpu.memory_space<vmem>>, vector<1x3x1xi8>,
    %c0_85 = arith.constant 0 : index
    %c31_86 = arith.constant 31 : index
    %c0_87 = arith.constant 0 : index
    %56 = vector.load %arg1[%c0_85, %c31_86, %c0_87] : memref<1x32x16xi8, #tpu.memory_space<vmem>>, vector<1x1x16xi8>
    %57 = vector.shape_cast %56 : vector<1x1x16xi8> to vector<1x1x16xi8>
    %58 = vector.broadcast %57 : vector<1x1x16xi8> to vector<1x3x16xi8>
    %c0_88 = arith.constant 0 : index
    %c39_89 = arith.constant 39 : index
    %c1_90 = arith.constant 1 : index
    %59 = vector.load %arg2[%c0_88, %c39_89, %c1_90] : memref<1x42x19xi8, #tpu.memory_space<vmem>>, vector<1x3x16xi8>
    tpu.vector_store %arg2[%c0_88, %c39_89, %c1_90], %58 {strides = array<i32>} : memref<1x42x19xi8, #tpu.memory_space<vmem>>, vector<1x3x16xi8>,
    %c0_91 = arith.constant 0 : index
    %c31_92 = arith.constant 31 : index
    %c15_93 = arith.constant 15 : index
    %60 = vector.load %arg1[%c0_91, %c31_92, %c15_93] : memref<1x32x16xi8, #tpu.memory_space<vmem>>, vector<1x1x1xi8>
    %61 = vector.shape_cast %60 : vector<1x1x1xi8> to vector<1x1x1xi8>
    %62 = vector.broadcast %61 : vector<1x1x1xi8> to vector<1x3x2xi8>
    %c0_94 = arith.constant 0 : index
    %c39_95 = arith.constant 39 : index
    %c17_96 = arith.constant 17 : index
    %63 = vector.load %arg2[%c0_94, %c39_95, %c17_96] : memref<1x42x19xi8, #tpu.memory_space<vmem>>, vector<1x3x2xi8>
    tpu.vector_store %arg2[%c0_94, %c39_95, %c17_96], %62 {strides = array<i32>} : memref<1x42x19xi8, #tpu.memory_space<vmem>>, vector<1x3x2xi8>,
    return
  }
  func.func @transform_0(%arg0: i32) -> (i32, i32, i32) {
    %c0_i32 = arith.constant 0 : i32
    %c0_i32_0 = arith.constant 0 : i32
    %c0_i32_1 = arith.constant 0 : i32
    return %arg0, %c0_i32, %c0_i32_0 : i32, i32, i32
  }
  func.func @transform_1(%arg0: i32) -> (i32, i32, i32) {
    %c0_i32 = arith.constant 0 : i32
    %c0_i32_0 = arith.constant 0 : i32
    %c0_i32_1 = arith.constant 0 : i32
    return %arg0, %c0_i32, %c0_i32_0 : i32, i32, i32
  }
}

</mosaic_0001>

<bundles_post_ra>
// kernel: tpu_custom_call.1
= control target key start
LH: loop header
LB: loop body
LE: loop exit
PB: predicated region body
PF: predicated region fallthrough
CT: control target
= control target key end

     0   :  { %s684_s6 = smov 0   ;;  %s1007_s0 = inlined_call_operand.vmem [shape: s8[4,32,16], index: 0, kind: input, shape index: {}]   ;;  %s1008_s1 = inlined_call_operand.vmem [shape: s8[4,42,19], index: 1, kind: output, shape index: {}]  }
   0x1 LB: > { %s624_s7 = sadd.s32 4294967295, %s665_s6   ;;  %p628_p0 = scmp.ge.s32.totalorder %s665_s6, 1  ;;  %s665_s6 = sphi %s684_s6, %s11_s6  }
   0x2   : > { %p86_p1 = scmp.lt.s32.totalorder %s665_s6, 5 }
   0x4   : > { %p87_p2 = pnand %p628_p0, %p86_p1 }
   0x5   : > { %p105_p3 = scmp.lt.s32.totalorder (!%p87_p2), %s624_s7, 3  ;;  %s668_s12 = smov (!%p87_p2), 113  }
   0x6   : > { %90 = sbr.rel (%p87_p2) target bundleno = 245 (0xf5), region = 24  ;;  %s669_s17 = smov (!%p87_p2), 1  }
   0xb   : > { %v118_v0 = vlaneseq  ;;  %v667_v1 = vmov 15   ;;  %s1030_s7 = smov (!%p105_p3, %s624_s7), 3  ;;  %vm123_vm0 = vsmask.f32 256  ;;  %vm166_vm1 = vsmask.f32 2312 }
   0xc   : > { %657 = vset.pattern.permute.xlu1 %v667_v1  ;;  %658 = vset.pattern.permute.xlu0 %v667_v1  ;;  %s629_s8 = sshll.u32 %s1030_s7, 3  ;;  %vm122_vm2 = vcmask 0   ;;  %vm168_vm3 = vsmask.f32 4368  ;;  %s633_s13 = smul.u32 12, %s1030_s7  ;;  %vm745_vm5 = vmor %vm123_vm0, %vm166_vm1  ;;  %vm189_vm6 = vcmask 1024  }
   0xd   : > { %v695_v2 = vshrl.u32 %v118_v0, 7  ;;  %s700_s11 = scalar_lea.vmem %s1007_s0, %s629_s8  ;;  %vm170_vm4 = vsmask.f32 6424  ;;  %vm755_vm7 = vmand %vm122_vm2, %vm123_vm0  ;;  %vm388_vm10 = vsmask.f32 1536 }
   0xe   : > { %v146_v3 = vld [vmem:[%s700_s11] sm:$0x1]  ;;  %v319_v4 = vld [vmem:[%s700_s11] sm:$0x8]  ;;  %v367_v7 = vld [vmem:[%s700_s11] sm:$0x10]  ;;  %s736_s16 = scalar_lea.vmem %s1008_s1, %s633_s13 }
   0xf   : > { %v240_v5 = vld [vmem:[%s700_s11] sm:$0xf]  ;;  %147 = vrot.lane.b32.xlu0 %v146_v3, %s668_s12  ;;  %v321_v6 = vshrl.u32 %v319_v4, 24  ;;  %v551_v11 = vld [vmem:[%s700_s11] sm:$0x80]  ;;  %v294_v13 = vsub.s32 3, %v695_v2  ;;  %vm766_vm8 = vmor %vm745_vm5, %vm168_vm3 }
  0x10   : > { %243 = vperm.xlu1 %657, %v240_v5   ;;  %v200_v8 = vld [vmem:[%s700_s11] sm:$0xf]  ;;  %v553_v15 = vshrl.u32 %v551_v11, 24  ;;  %v120_v18 = vsub.s32 0, %v695_v2  ;;  %v368_v19 = vrot.slane %v367_v7, 4  ;;  %vm785_vm9 = vmor %vm766_vm8, %vm170_vm4  ;;  %vm141_vm3 = vcmask 131080  }
  0x11   : > { %v202_v9 = vunpack.c.1.s8 %v200_v8  ;;  %v201_v10 = vunpack.c.0.s8 %v200_v8  ;;  %v287_v12 = vld [vmem:[%s700_s11] sm:$0x8]  ;;  %v323_v14 = vrot.slane %v321_v6, 3  ;;  %v128_v22 = vld [vmem:[%s700_s11] sm:$0x1]  ;;  %vm420_vm1 = vmand %vm189_vm6, %vm388_vm10  ;;  %vm230_vm5 = vcmask 132104  }
  0x12   : > { %v289_v16 = vshrl.u32 %v287_v12, 24  ;;  %v301_v17 = vld [vmem:[%s700_s11] sm:$0x8]  ;;  %v114_v23 = vld [vmem:[%s700_s11] sm:$0x1]  ;;  %v130_v25 = vpack.i.b16 %v128_v22, %v128_v22  ;;  %v555_v34 = vrot.slane %v553_v15, 7  ;;  %vm842_vm4 = vmand %vm141_vm3, %vm123_vm0 }
  0x13   : > { %v205_v20 = vpack.c.b16 %v202_v9, %v202_v9  ;;  %v303_v21 = vshrl.u32 %v301_v17, 24  ;;  %324 = vrot.lane.b32.xlu0 %v323_v14, %s668_s12  ;;  %v116_v26 = vpack.i.b16 %v114_v23, %v114_v23  ;;  %v424_v27 = vld [vmem:[%s700_s11] sm:$0xf0]  ;;  %v203_v28 = vpack.c.b16 %v201_v10, %v201_v10  ;;  %v159_v33 = vld [vmem:[%s700_s11] sm:$0xf]  ;;  %vm461_vm8 = vmand %vm230_vm5, %vm388_vm10 }
  0x14   : > { %v290_v24 = vpack.i.b16 %v289_v16, %v289_v16  ;;  %v426_v31 = vunpack.c.3.s8 %v424_v27  ;;  %v425_v32 = vunpack.c.2.s8 %v424_v27  ;;  %v131_v36 = vpack.i.b8 %v130_v25, %v130_v25  ;;  %v125_v4 = vld [vmem:[%s736_s16] sm:$0x1]  ;;  %v335_v11 = vld [vmem:[%s700_s11] sm:$0x10] }
  0x15   : > { %v717_v29 = vpack.c.b8 %v205_v20, %v205_v20  ;;  %v304_v30 = vpack.i.b16 %v303_v21, %v303_v21  ;;  %v160_v37 = vunpack.c.0.s8 %v159_v33  ;;  %v117_v44 = vpack.i.b8 %v116_v26, %v116_v26  ;;  %v465_v12 = vld [vmem:[%s700_s11] sm:$0xf0] }
  0x16   : > { %v291_v35 = vpack.i.b8 %v290_v24, %v290_v24  ;;  %v429_v40 = vpack.c.b16 %v426_v31, %v426_v31  ;;  %v427_v41 = vpack.c.b16 %v425_v32, %v425_v32  ;;  %v135_v43 = vrot.slane %v131_v36, %v120_v18  ;;  %v513_v24 = vld [vmem:[%s700_s11] sm:$0x80]  ;;  %v197_v27 = vld [vmem:[%s736_s16 + $0x4] sm:$0x1] }
  0x17   : > { %v216_v38 = vshrl.u32 %v717_v29, 16  ;;  %v305_v39 = vpack.i.b8 %v304_v30, %v304_v30  ;;  %369 = vrot.lane.b32.xlu0 %v368_v19, %s668_s12  ;;  %v161_v45 = vunpack.c.1.s8 %v159_v33  ;;  %v162_v51 = vpack.c.b16 %v160_v37, %v160_v37  ;;  %v531_v31 = vld [vmem:[%s700_s11] sm:$0x80] }
  0x18   : > { %v722_v42 = vrot.slane %v291_v35, %v294_v13  ;;  %v430_v48 = vpack.c.b8 %v429_v40, %v429_v40  ;;  %v136_v49 = vunpack.c.0.s8 %v135_v43  ;;  %v727_v50 = vpack.c.b8 %v427_v41, %v427_v41  ;;  %v381_v40 = vld [vmem:[%s700_s11] sm:$0xf0] }
  0x19   : > { %v725_v46 = vrot.slane %v216_v38, 7  ;;  %v309_v47 = vrot.slane %v305_v39, %v294_v13  ;;  %v164_v52 = vpack.c.b16 %v161_v45, %v161_v45  ;;  %v121_v58 = vrot.slane %v117_v44, %v120_v18  ;;  %v349_v18 = vld [vmem:[%s700_s11] sm:$0x10] }
  0x1a   : > { %v441_v55 = vshll.u32 %v430_v48, 24  ;;  %v445_v56 = vshrl.u32 %v430_v48, 8  ;;  %v137_v57 = vpack.c.b16 %v136_v49, %v136_v49  ;;  %v163_v59 = vpack.c.b8 %v162_v51, %v162_v51 }
  0x1b   : > { %v223_v53 = vrot.slane %v725_v46, 2  ;;  %v310_v54 = vunpack.c.0.s8 %v309_v47  ;;  %556 = vrot.lane.b32.xlu0 %v555_v34, %s668_s12  ;;  %v731_v60 = vpack.c.b8 %v203_v28, %v203_v28  ;;  %v165_v0 = vpack.c.b8 %v164_v52, %v164_v52 }
  0x1c   : > { %v739_v62 = vrot.slane %v441_v55, 7  ;;  %v447_v63 = vrot.slane %v445_v56, 6  ;;  %v138_v1 = vpack.c.b8 %v137_v57, %v137_v57  ;;  %v432_v3 = vshll.u32 %v727_v50, 24 }
  0x1d   : > { %228 = vrot.lane.b32.xlu1 %v223_v53, %s669_s17  ;;  %v311_v61 = vpack.c.b16 %v310_v54, %v310_v54  ;;  %v173_v6 = vshrl.u32 %v163_v59, 16  ;;  %v176_v9 = vshll.u32 %v163_v59, 16  ;;  %v181_v10 = vshrl.u32 %v165_v0, 16 }
  0x1e   : > { %v448_v8 = vor.u32 %v447_v63, %v739_v62  ;;  %v184_v15 = vshll.u32 %v165_v0, 16  ;;  %v208_v16 = vshrl.u32 %v731_v60, 16  ;;  %v341_v17 = vsub.s32 4, %v695_v2 }
  0x1f   : > { %v312_v7 = vpack.c.b8 %v311_v61, %v311_v61  ;;  %139 = vrot.lane.b32.xlu0 %v138_v1, %s669_s17  ;;  %v175_v14 = vrot.slane %v173_v6, 7  ;;  %v183_v21 = vrot.slane %v181_v10, 7  ;;  %v219_v22 = vshll.u32 %v717_v29, 16 }
  0x20   : > { %v449_v19 = vrot.slane %v448_v8, 2  ;;  %v126_v23 = vsel %vm755_vm7, %v121_v58, %v125_v4  ;;  %v210_v28 = vrot.slane %v208_v16, 7  ;;  %v337_v30 = vpack.i.b16 %v335_v11, %v335_v11 }
  0x21   : > { %313 = vrot.lane.b32.xlu1 %v312_v7, %s669_s17  ;;  %v774_v25 = vor.u32 %v176_v9, %v175_v14  ;;  %v179_v26 = vrot.slane %v175_v14, 2  ;;  %127 = vst [vmem:[%s736_s16] sm:$0x1] %v126_v23  ;;  %v779_v32 = vrot.slane %v432_v3, 7  ;;  %v186_v33 = vor.u32 %v184_v15, %v183_v21 }
  0x22   : > { %v188_v34 = vrot.slane %v183_v21, 2  ;;  %v351_v35 = vpack.i.b16 %v349_v18, %v349_v18  ;;  %v214_v36 = vrot.slane %v210_v28, 2  ;;  %v221_v37 = vor.u32 %v219_v22, %v725_v46  ;;  %v528_v21 = vld [vmem:[%s736_s16 + $0xa] sm:$0x1] }
  0x23   : > { %454 = vrot.lane.b32.xlu0 %v449_v19, %s669_s17  ;;  %v338_v38 = vpack.i.b8 %v337_v30, %v337_v30  ;;  %v515_v39 = vshrl.u32 %v513_v24, 24  ;;  %v187_v41 = vsel %vm785_vm9, %v179_v26, %v186_v33  ;;  %v533_v45 = vshrl.u32 %v531_v31, 24 }
  0x24   : > { %v198_v43 = vsel %vm755_vm7, %v188_v34, %v197_v27  ;;  %v352_v44 = vpack.i.b8 %v351_v35, %v351_v35  ;;  %v520_v49 = vsub.s32 7, %v695_v2  ;;  %196 = vst.msk [vmem:[%s736_s16 + $0x2] sm:$0x3] %vm189_vm6, %v187_v41  ;;  %v382_v52 = vunpack.c.2.s8 %v381_v40 }
  0x25   : > { %468 = vperm.xlu1 %657, %v465_v12   ;;  %199 = vst [vmem:[%s736_s16 + $0x4] sm:$0x1] %v198_v43  ;;  %v796_v47 = vrot.slane %v338_v38, %v341_v17  ;;  %v516_v48 = vpack.i.b16 %v515_v39, %v515_v39  ;;  %v534_v51 = vpack.i.b16 %v533_v45, %v533_v45  ;;  %v383_v53 = vunpack.c.3.s8 %v381_v40 }
  0x26   : > { %v356_v46 = vrot.slane %v352_v44, %v341_v17  ;;  %v435_v54 = vshrl.u32 %v727_v50, 8  ;;  %v222_v55 = vsel %vm785_vm9, %v214_v36, %v221_v37  ;;  %v384_v59 = vpack.c.b16 %v382_v52, %v382_v52 }
  0x27   : > { %450 = vrot.lane.b32.xlu0 %v779_v32, %s669_s17  ;;  %v517_v56 = vpack.i.b8 %v516_v48, %v516_v48  ;;  %v535_v58 = vpack.i.b8 %v534_v51, %v534_v51  ;;  %v386_v61 = vpack.c.b16 %v383_v53, %v383_v53  ;;  %v211_v63 = vshll.u32 %v731_v60, 16 }
  0x28   : > { %v357_v57 = vunpack.c.0.s8 %v356_v46  ;;  %vm389_vm11 = vsmask.f32 3592  ;;  %v385_v4 = vpack.c.b8 %v384_v59, %v384_v59  ;;  %v437_v5 = vrot.slane %v435_v54, 6 }
  0x29   : > { %v521_v0 = vrot.slane %v517_v56, %v520_v49  ;;  %v539_v3 = vrot.slane %v535_v58, %v520_v49  ;;  %v387_v50 = vpack.c.b8 %v386_v61, %v386_v61  ;;  %vm390_vm12 = vmor %vm388_vm10, %vm389_vm11  ;;  %vm391_vm13 = vsmask.f32 5648 }
  0x2a   : > { %v358_v1 = vpack.c.b16 %v357_v57, %v357_v57  ;;  %v396_v9 = vshll.u32 %v385_v4, 24  ;;  %v399_v10 = vshrl.u32 %v385_v4, 8  ;;  %v213_v14 = vor.u32 %v211_v63, %v210_v28  ;;  %vm392_vm14 = vmor %vm390_vm12, %vm391_vm13  ;;  %v421_v28 = vld [vmem:[%s736_s16 + $0x8] sm:$0x3]  ;;  %v143_v57 = vld [vmem:[%s736_s16] sm:$0x1] }
  0x2b   : > { %226 = vrot.lane.b32.xlu0 %v222_v55, %s669_s17  ;;  %v522_v6 = vunpack.c.0.s8 %v521_v0  ;;  %v540_v8 = vunpack.c.0.s8 %v539_v3  ;;  %v405_v60 = vshll.u32 %v387_v50, 24  ;;  %v409_v12 = vshrl.u32 %v387_v50, 8 }
  0x2c   : > { %v359_v7 = vpack.c.b8 %v358_v1, %v358_v1  ;;  %v810_v16 = vrot.slane %v396_v9, 7  ;;  %v401_v17 = vrot.slane %v399_v10, 6  ;;  %v438_v18 = vor.u32 %v437_v5, %v779_v32  ;;  %v237_v52 = vld [vmem:[%s736_s16 + $0x4] sm:$0x1] }
  0x2d   : > { %v523_v11 = vpack.c.b16 %v522_v6, %v522_v6  ;;  %v541_v15 = vpack.c.b16 %v540_v8, %v540_v8  ;;  %v407_v19 = vrot.slane %v405_v60, 7  ;;  %v411_v20 = vrot.slane %v409_v12, 6 }
  0x2e   : > { %360 = vrot.lane.b32.xlu1 %v359_v7, %s669_s17  ;;  %vm393_vm15 = vsmask.f32 7704  ;;  %v402_v23 = vor.u32 %v401_v17, %v810_v16  ;;  %v439_v33 = vrot.slane %v438_v18, 2  ;;  %v670_v36 = vmov 842150450  }
  0x2f   : > { %v814_v22 = vpack.c.b8 %v523_v11, %v523_v11  ;;  %v412_v24 = vor.u32 %v411_v20, %v407_v19  ;;  %v542_v26 = vpack.c.b8 %v541_v15, %v541_v15  ;;  %vm824_vm2 = vmor %vm392_vm14, %vm393_vm15  ;;  %v254_v37 = vunpack.c.l.s4 %v670_v36 }
  0x30   : > { %v403_v27 = vrot.slane %v402_v23, 2  ;;  %v444_v13 = vsel %vm824_vm2, %v439_v33, %v739_v62  ;;  %v671_v39 = vmov 269488144   ;;  %v672_v4 = vmov 1414812756  }
  0x31   : > { %v529_v30 = vsel %vm755_vm7, %v814_v22, %v528_v21  ;;  %v413_v32 = vrot.slane %v412_v24, 2  ;;  %v247_v40 = vunpack.c.l.s4 %v671_v39  ;;  %v255_v41 = vunpack.c.0.s8 %v254_v37 }
  0x32   : > { %224 = vrot.lane.b32.xlu1 %v213_v14, %s669_s17  ;;  %530 = vst [vmem:[%s736_s16 + $0xa] sm:$0x1] %v529_v30  ;;  %v408_v34 = vsel %vm824_vm2, %v403_v27, %v407_v19  ;;  %vm154_vm7 = vcmask 147592   ;;  %v472_v50 = vunpack.c.l.s4 %v672_v4  ;;  %v673_v5 = vmov 1987475062  }
  0x33   : > { %v422_v35 = vsel %vm420_vm1, %v413_v32, %v421_v28  ;;  %419 = vst.msk [vmem:[%s736_s16 + $0x6] sm:$0x3] %vm189_vm6, %v408_v34  ;;  %v248_v44 = vunpack.c.0.s8 %v247_v40  ;;  %v258_v45 = vsub.s32 %v255_v41, %v695_v2  ;;  %v479_v6 = vunpack.c.l.s4 %v673_v5  ;;  %vm861_vm11 = vmand %vm154_vm7, %vm123_vm0 }
  0x34   : > { %423 = vst [vmem:[%s736_s16 + $0x8] sm:$0x3] %v422_v35  ;;  %v473_v14 = vunpack.c.0.s8 %v472_v50  ;;  %vm296_vm0 = vsmask.f32 1026  ;;  %vm277_vm12 = vcmask 148616  }
  0x35   : > { %v251_v62 = vsub.s32 %v248_v44, %v695_v2  ;;  %v480_v15 = vunpack.c.0.s8 %v479_v6  ;;  %vm297_vm13 = vmand %vm189_vm6, %vm296_vm0  ;;  %vm414_vm15 = vsmask.f32 7943  ;;  %vm190_vm7 = vsmask.f32 7938 }
  0x36   : > { %543 = vrot.lane.b32.xlu1 %v542_v26, %s669_s17  ;;  %v476_v21 = vsub.s32 %v473_v14, %v695_v2  ;;  %vm509_vm14 = vmand %vm277_vm12, %vm388_vm10  ;;  %vm343_vm10 = vcmask 1025  }
  0x37   : > { %v483_v23 = vsub.s32 %v480_v15, %v695_v2  ;;  %vm911_vm1 = vmand %vm343_vm10, %vm414_vm15 }
  0x3a   : > { %452 = vrot.lane.b32.xlu1 %v444_v13, %s669_s17 }
  0x3b   : > { %v462_v1 = vld [vmem:[%s736_s16 + $0x8] sm:$0x3] }
  0x81   : > { %v148_v38 = vpop.permute.xlu0 %147 }
  0x82   : > { %634 = vpush %v148_v38 }
  0x85   : > { %v325_v43 = vpop.permute.xlu0 %324 }
  0x86   : > { %636 = vpush %v325_v43 }
  0x89   : > { %v370_v48 = vpop.permute.xlu0 %369 }
  0x8a   : > { %638 = vpush %v370_v48  ;;  %v548_v48 = vld [vmem:[%s736_s16 + $0xa] sm:$0x1] }
  0x8b   : > { %v244_v49 = vpop.permute.xlu1 %243 }
  0x8c   : > { %v259_v46 = vrot.slane %v244_v49, %v258_v45  ;;  %v847_v54 = vrot.slane %v244_v49, %v251_v62 }
  0x8d   : > { %v557_v53 = vpop.permute.xlu0 %556 }
  0x8e   : > { %640 = vpush %v557_v53  ;;  %v269_v55 = vshrl.u32 %v259_v46, 16  ;;  %v261_v61 = vshrl.u32 %v847_v54, 16  ;;  %v272_v10 = vshll.u32 %v259_v46, 16 }
  0x8f   : > { %v229_v56 = vpop.permute.xlu1 %228 }
  0x90   : > { %v238_v58 = vsel %vm842_vm4, %v229_v56, %v237_v52  ;;  %v271_v63 = vrot.slane %v269_v55, 7  ;;  %v865_v9 = vrot.slane %v261_v61, 7 }
  0x91   : > { %239 = vst [vmem:[%s736_s16 + $0x4] sm:$0x1] %v238_v58  ;;  %v140_v59 = vpop.permute.xlu0 %139 }
  0x92   : > { %v144_v0 = vsel %vm842_vm4, %v140_v59, %v143_v57  ;;  %v276_v3 = vrot.slane %v271_v63, 2  ;;  %v267_v19 = vrot.slane %v865_v9, 2  ;;  %v274_v20 = vor.u32 %v272_v10, %v271_v63 }
  0x93   : > { %145 = vst [vmem:[%s736_s16] sm:$0x1] %v144_v0  ;;  %v314_v18 = vpop.permute.xlu1 %313 }
  0x94   : > { %v275_v26 = vsel %vm785_vm9, %v267_v19, %v274_v20  ;;  %vm315_vm9 = vmand %vm230_vm5, %vm296_vm0 }
  0x95   : > { %v455_v8 = vpop.permute.xlu0 %454 }
  0x96   : > { %v463_v11 = vsel %vm461_vm8, %v455_v8, %v462_v1  ;;  %vm191_vm8 = vmand %vm189_vm6, %vm190_vm7 }
  0x97   : > { %464 = vst [vmem:[%s736_s16 + $0x8] sm:$0x3] %v463_v11 }
  0x98   : > { %v284_v60 = vld [vmem:[%s736_s16 + $0x4] sm:$0x1] }
  0x99   : > { %v285_v12 = vsel %vm861_vm11, %v276_v3, %v284_v60  ;;  %v872_v17 = vpop.permute.xlu0 %450 }
  0x9a   : > { %286 = vst [vmem:[%s736_s16 + $0x4] sm:$0x1] %v285_v12  ;;  %v156_v61 = vld [vmem:[%s736_s16] sm:$0x1] }
  0x9d   : > { %v227_v24 = vpop.permute.xlu0 %226 }
  0x9e   : > { %236 = vst.msk [vmem:[%s736_s16 + $0x2] sm:$0x3] %vm230_vm5, %v227_v24  ;;  %v510_v40 = vld [vmem:[%s736_s16 + $0x8] sm:$0x3] }
  0x9f   : > { %283 = vst.msk [vmem:[%s736_s16 + $0x2] sm:$0x3] %vm277_vm12, %v275_v26 }
  0xa0   : > { %v469_v27 = vpop.permute.xlu1 %468 }
  0xa1   : > { %v298_v28 = vld [vmem:[%s736_s16 + $0x4] sm:$0x3]  ;;  %v477_v30 = vrot.slane %v469_v27, %v476_v21  ;;  %v484_v32 = vrot.slane %v469_v27, %v483_v23 }
  0xa2   : > { %v299_v33 = vsel %vm297_vm13, %v722_v42, %v298_v28  ;;  %vm344_vm13 = vsmask.f32 1541 }
  0xa3   : > { %300 = vst [vmem:[%s736_s16 + $0x4] sm:$0x3] %v299_v33  ;;  %v486_v2 = vshll.u32 %v477_v30, 24  ;;  %v489_v34 = vshrl.u32 %v477_v30, 8  ;;  %v495_v29 = vshll.u32 %v484_v32, 24  ;;  %v499_v35 = vshrl.u32 %v484_v32, 8  ;;  %vm345_vm6 = vmand %vm343_vm10, %vm344_vm13 }
  0xa4   : > { %v888_v13 = vpop.permute.xlu1 %360 }
  0xa5   : > { %v890_v36 = vrot.slane %v486_v2, 7  ;;  %v491_v37 = vrot.slane %v489_v34, 6  ;;  %v497_v38 = vrot.slane %v495_v29, 7  ;;  %v501_v39 = vrot.slane %v499_v35, 6 }
  0xa7   : > { %v502_v42 = vor.u32 %v501_v39, %v497_v38  ;;  %v492_v43 = vor.u32 %v491_v37, %v890_v36 }
  0xa8   : > { %v897_v41 = vpop.permute.xlu1 %224 }
  0xa9   : > { %v503_v44 = vrot.slane %v502_v42, 2  ;;  %v493_v52 = vrot.slane %v492_v43, 2 }
  0xaa   : > { %v316_v45 = vld [vmem:[%s736_s16 + $0x4] sm:$0x3] }
  0xab   : > { %v317_v62 = vsel %vm315_vm9, %v314_v18, %v316_v45  ;;  %v511_v49 = vsel %vm509_vm14, %v503_v44, %v510_v40  ;;  %v498_v56 = vsel %vm824_vm2, %v493_v52, %v497_v38  ;;  %vm362_vm2 = vcmask 132105   ;;  %vm231_vm14 = vmand %vm230_vm5, %vm190_vm7 }
  0xac   : > { %318 = vst [vmem:[%s736_s16 + $0x4] sm:$0x3] %v317_v62  ;;  %512 = vst [vmem:[%s736_s16 + $0x8] sm:$0x3] %v511_v49  ;;  %v544_v46 = vpop.permute.xlu1 %543 }
  0xad   : > { %v549_v53 = vsel %vm842_vm4, %v544_v46, %v548_v48  ;;  %vm927_vm3 = vmand %vm362_vm2, %vm414_vm15 }
  0xae   : > { %550 = vst [vmem:[%s736_s16 + $0xa] sm:$0x1] %v549_v53  ;;  %vm331_vm4 = vmand %vm277_vm12, %vm296_vm0  ;;  %vm376_vm0 = vcmask 148617  }
  0xaf   : > { %vm950_vm9 = vmand %vm376_vm0, %vm414_vm15 }
  0xb0   : > { %v453_v55 = vpop.permute.xlu1 %452  ;;  %vm363_vm10 = vmand %vm362_vm2, %vm344_vm13 }
  0xb1   : > { %460 = vst.msk [vmem:[%s736_s16 + $0x6] sm:$0x3] %vm230_vm5, %v453_v55  ;;  %vm278_vm5 = vmand %vm277_vm12, %vm190_vm7 }
  0xb2   : > { %508 = vst.msk [vmem:[%s736_s16 + $0x6] sm:$0x3] %vm277_vm12, %v498_v56 }
  0xb3   : > { %v525_v51 = vld [vmem:[%s736_s16 + $0x8] sm:$0x2]  ;;  %s635_s18 = spop %634  ;;  %v332_v6 = vld [vmem:[%s736_s16 + $0x4] sm:$0x3] }
  0xb4   : > { %v526_v58 = vsel %vm911_vm1, %v814_v22, %v525_v51  ;;  %v151_v31 = vstv %s635_s18 }
  0xb5   : > { %527 = vst [vmem:[%s736_s16 + $0x8] sm:$0x2] %v526_v58  ;;  %v152_v59 = vpack.i.b16 %v151_v31, %v151_v31  ;;  %v566_v15 = vld [vmem:[%s736_s16 + $0xa] sm:$0x1] }
  0xb7   : > { %v153_v63 = vpack.i.b8 %v152_v59, %v152_v59  ;;  %s637_s19 = spop %636 }
  0xb8   : > { %v328_v0 = vstv %s637_s19 }
  0xb9   : > { %v157_v22 = vsel %vm861_vm11, %v153_v63, %v156_v61  ;;  %v329_v3 = vpack.i.b16 %v328_v0, %v328_v0 }
  0xba   : > { %158 = vst [vmem:[%s736_s16] sm:$0x1] %v157_v22 }
  0xbb   : > { %v330_v50 = vpack.i.b8 %v329_v3, %v329_v3  ;;  %s941_s20 = spop %638 }
  0xbc   : > { %v545_v4 = vld [vmem:[%s736_s16 + $0x8] sm:$0x2]  ;;  %v373_v7 = vstv %s941_s20 }
  0xbd   : > { %v546_v5 = vsel %vm927_vm3, %v544_v46, %v545_v4  ;;  %v333_v8 = vsel %vm331_vm4, %v330_v50, %v332_v6  ;;  %v374_v30 = vpack.i.b16 %v373_v7, %v373_v7 }
  0xbe   : > { %547 = vst [vmem:[%s736_s16 + $0x8] sm:$0x2] %v546_v5  ;;  %334 = vst [vmem:[%s736_s16 + $0x4] sm:$0x3] %v333_v8 }
  0xbf   : > { %s641_s21 = spop %640  ;;  %v375_v34 = vpack.i.b8 %v374_v30, %v374_v30 }
  0xc0   : > { %v560_v10 = vstv %s641_s21 }
  0xc1   : > { %v192_v11 = vld [vmem:[%s736_s16] sm:$0x3]  ;;  %v561_v60 = vpack.i.b16 %v560_v10, %v560_v10 }
  0xc2   : > { %v193_v12 = vsel %vm191_vm8, %v774_v25, %v192_v11 }
  0xc3   : > { %194 = vst [vmem:[%s736_s16] sm:$0x3] %v193_v12  ;;  %v562_v18 = vpack.i.b8 %v561_v60, %v561_v60 }
  0xc5   : > { %v563_v19 = vld [vmem:[%s736_s16 + $0x8] sm:$0x2]  ;;  %v346_v20 = vld [vmem:[%s736_s16 + $0x4] sm:$0x2]  ;;  %v567_v21 = vsel %vm861_vm11, %v562_v18, %v566_v15  ;;  %vm377_vm11 = vmand %vm376_vm0, %vm344_vm13 }
  0xc6   : > { %v564_v25 = vsel %vm950_vm9, %v562_v18, %v563_v19  ;;  %v347_v23 = vsel %vm345_vm6, %v796_v47, %v346_v20  ;;  %568 = vst [vmem:[%s736_s16 + $0xa] sm:$0x1] %v567_v21  ;;  %v264_v47 = vshll.u32 %v847_v54, 16 }
  0xc7   : > { %565 = vst [vmem:[%s736_s16 + $0x8] sm:$0x2] %v564_v25  ;;  %348 = vst [vmem:[%s736_s16 + $0x4] sm:$0x2] %v347_v23 }
  0xc8   : > { %v266_v32 = vor.u32 %v264_v47, %v865_v9 }
  0xca   : > { %v232_v24 = vld [vmem:[%s736_s16] sm:$0x3] }
  0xcb   : > { %v233_v26 = vsel %vm231_vm14, %v897_v41, %v232_v24 }
  0xcc   : > { %234 = vst [vmem:[%s736_s16] sm:$0x3] %v233_v26 }
  0xce   : > { %v364_v27 = vld [vmem:[%s736_s16 + $0x4] sm:$0x2] }
  0xcf   : > { %v365_v28 = vsel %vm363_vm10, %v888_v13, %v364_v27 }
  0xd0   : > { %366 = vst [vmem:[%s736_s16 + $0x4] sm:$0x2] %v365_v28 }
  0xd3   : > { %v279_v33 = vld [vmem:[%s736_s16] sm:$0x3] }
  0xd4   : > { %v280_v2 = vsel %vm278_vm5, %v266_v32, %v279_v33 }
  0xd5   : > { %281 = vst [vmem:[%s736_s16] sm:$0x3] %v280_v2 }
  0xd7   : > { %v378_v54 = vld [vmem:[%s736_s16 + $0x4] sm:$0x2] }
  0xd8   : > { %v379_v29 = vsel %vm377_vm11, %v375_v34, %v378_v54 }
  0xd9   : > { %380 = vst [vmem:[%s736_s16 + $0x4] sm:$0x2] %v379_v29 }
  0xe0   : > { %v416_v35 = vld [vmem:[%s736_s16 + $0x4] sm:$0x2] }
  0xe1   : > { %v417_v13 = vsel %vm911_vm1, %v810_v16, %v416_v35 }
  0xe2   : > { %418 = vst [vmem:[%s736_s16 + $0x4] sm:$0x2] %v417_v13 }
  0xe9   : > { %v457_v37 = vld [vmem:[%s736_s16 + $0x4] sm:$0x2] }
  0xea   : > { %v458_v9 = vsel %vm927_vm3, %v872_v17, %v457_v37 }
  0xeb   : > { %459 = vst [vmem:[%s736_s16 + $0x4] sm:$0x2] %v458_v9 }
  0xf2   : > { %v505_v38 = vld [vmem:[%s736_s16 + $0x4] sm:$0x2] }
  0xf3   : > { %v506_v39 = vsel %vm950_vm9, %v890_v36, %v505_v38 }
  0xf4   : > { %507 = vst [vmem:[%s736_s16 + $0x4] sm:$0x2] %v506_v39 }
  0xf5 PF: > { %s11_s6 = sadd.s32 1, %s665_s6  }
  0xf6   : > { %p8_p4 = scmp.ge.s32.totalorder %s11_s6, 6  }
  0xf8   :  { %10 = sbr.rel (!%p8_p4) target bundleno = 1 (0x1), region = 54 }

</bundles_post_ra>
